<compile_context>
chip_gen: v7x
topology: tpu7x:2x2x1
jax: 0.10.0
libtpu: 0.0.40
codegen_flags: <defaults>
</compile_context>

<pallas_src>
import functools

import jax
import jax.numpy as jnp
from jax.experimental import pallas as pl
from jax.experimental.pallas import tpu as pltpu

BN_EPS = 1e-5


def _round_up(v, m):
    return (v + m - 1) // m * m


def _pad2(a, rows, cols):
    a = jnp.asarray(a)
    pr, pc = rows - a.shape[0], cols - a.shape[1]
    if pr == 0 and pc == 0:
        return a
    return jnp.pad(a, ((0, pr), (0, pc)))


def _default_vmem_limit_bytes():
    """Per-generation scoped-VMEM limit (review items: raise on v5e/v6e, cap on v7x)."""
    try:
        kind = jax.devices()[0].device_kind.lower()
    except Exception:
        return 32 * 1024 * 1024
    if ("v5e" in kind) or ("v5 lite" in kind) or ("v6" in kind):
        return 96 * 1024 * 1024          # 128 MiB physical VMEM
    return 48 * 1024 * 1024              # v7x has 64 MiB physical; stay well under


def _pick_tiles(B, D_in_p, H_p, D_out_p, budget, cache_l1):
    """Largest lane-dense tiles whose (double-buffered) VMEM footprint fits `budget`."""
    cands = (1024, 512, 256, 128)

    def largest(dim):
        for c in cands:
            if dim % c == 0:
                return c
        return 128

    def est(th, tn):
        b = 2 * B * D_in_p * 2          # xm (bf16)
        b += 2 * B * tn * 4             # xr (f32 residual slice)
        b += 2 * D_in_p * th * 2        # w1 tile (bf16)
        b += 2 * 2 * th * 4             # gamma/beta tile
        b += 2 * th * tn * 2            # w2 tile (bf16)
        b += 2 * tn * 4                 # b2 tile
        b += 2 * B * tn * 4             # output block (f32 accumulator)
        if cache_l1:
            b += B * H_p * 2            # activation cache (bf16)
        return b

    th, tn = largest(H_p), largest(D_out_p)
    while est(th, tn) > budget and (th > 128 or tn > 128):
        if th >= tn and th > 128:
            th //= 2
        elif tn > 128:
            tn //= 2
        else:
            th //= 2
    return th, tn


def fc2_kernel(coeff_ref,               # SMEM (1, 1) f32
               xm_ref,                  # VMEM (B, D_in_p) bf16    (matmul operand, resident)
               xr_ref,                  # VMEM (B, TILE_N) f32     (residual slice)
               w1_ref,                  # VMEM (D_in_p, TILE_H) bf16
               gb_ref,                  # VMEM (2, TILE_H) f32     (row0=gamma, row1=beta)
               w2_ref,                  # VMEM (TILE_H, TILE_N) bf16
               b2_ref,                  # VMEM (1, TILE_N) f32
               o_ref,                   # VMEM (B, TILE_N) f32     (doubles as accumulator)
               *scratch,                # [(B, H_p) bf16 activation cache] iff cache_l1
               cache_l1, tile_h):
    n_idx = pl.program_id(0)
    h_idx = pl.program_id(1)

    # h == 0: init the VMEM-resident output accumulator with the layer2 bias
    # (b2 folded into init -> nothing to add in the epilogue).
    @pl.when(h_idx == 0)
    def _init():
        o_ref[...] = jnp.broadcast_to(b2_ref[...], o_ref.shape)

    def _layer1_tile():
        # Linear (no bias: cancelled by train-mode BN) -> BN (one-pass batch stats,
        # folded into a single affine) -> ReLU, for this hidden tile.
        a = jnp.dot(xm_ref[...], w1_ref[...], preferred_element_type=jnp.float32)
        mean = jnp.mean(a, axis=0, keepdims=True)
        ex2 = jnp.mean(a * a, axis=0, keepdims=True)
        var = jnp.maximum(ex2 - mean * mean, 0.0)          # biased batch variance
        inv_std = jax.lax.rsqrt(var + BN_EPS)               # EUP slot
        gb = gb_ref[...]
        scale = gb[0:1, :] * inv_std
        shift = gb[1:2, :] - mean * scale
        return jnp.maximum(a * scale + shift, 0.0).astype(jnp.bfloat16)

    if cache_l1:
        # Single-core path: compute each activated h-tile once (first n pass) and
        # reuse it from the VMEM cache for all later n tiles.
        hcache_ref = scratch[0]
        col0 = pl.multiple_of(h_idx * tile_h, tile_h)

        @pl.when(n_idx == 0)
        def _fill_cache():
            hcache_ref[:, pl.ds(col0, tile_h)] = _layer1_tile()

        act = hcache_ref[:, pl.ds(col0, tile_h)]
    else:
        # Megacore path: recompute per n-shard (per-core VMEM cache can't be shared).
        act = _layer1_tile()

    # layer2 partial product for this (h-tile, n-tile); accumulate directly into the
    # resident output block (no separate acc scratch).
    o_ref[...] += jnp.dot(act, w2_ref[...], preferred_element_type=jnp.float32)

    @pl.when(h_idx == pl.num_programs(1) - 1)
    def _epilogue():
        c = coeff_ref[0, 0]
        xr = xr_ref[...]
        o_ref[...] = xr + c * (o_ref[...] - xr)      # == c*y + (1-c)*x, one multiply


def fully_connected2(x, params, *, tile_h=None, tile_n=None, megacore=False,
                     vmem_limit_bytes=None):
    """x: [B, D_in] float32. params: dict of pre-transposed weights. Returns [B, D_out].

    megacore=False (default): layer1 cached across n tiles, minimal HBM weight traffic,
                              sequential grid (safe on any number of TensorCores).
    megacore=True:            n axis marked "parallel" (>=2 tiles) for 2-TC chips (v7x);
                              layer1 recomputed per n-shard.
    """
    B, D_in = x.shape
    H = params["w1"].shape[1]
    D_out = params["w2"].shape[1]
    assert D_out == D_in, "residual requires out_dim == in_dim"

    # Lane-dense padded feature dims (multiples of 128).
    D_in_p = _round_up(D_in, 128)
    H_p = _round_up(H, 128)
    D_out_p = _round_up(D_out, 128)

    cache_l1 = not megacore
    if vmem_limit_bytes is None:
        vmem_limit_bytes = _default_vmem_limit_bytes()

    auto_h, auto_n = _pick_tiles(B, D_in_p, H_p, D_out_p,
                                 budget=vmem_limit_bytes // 2, cache_l1=cache_l1)
    tile_h = tile_h or auto_h
    if tile_n is None:
        tile_n = auto_n
        # v7x megacore: give the parallel n axis >= 2 tiles so both cores get work.
        if megacore and D_out_p // tile_n < 2 and tile_n >= 256:
            tile_n //= 2
    assert H_p % tile_h == 0 and D_out_p % tile_n == 0
    n_tiles = D_out_p // tile_n
    h_tiles = H_p // tile_h

    # Operand prep: bf16 for MXU operands, f32 for elementwise params / residual.
    x32 = _pad2(x.astype(jnp.float32), B, D_in_p)                      # residual source
    xm = x32.astype(jnp.bfloat16)                                      # matmul operand
    w1 = _pad2(params["w1"], D_in_p, H_p).astype(jnp.bfloat16)
    gb = jnp.concatenate([_pad2(params["gamma"].reshape(1, -1), 1, H_p),
                          _pad2(params["beta"].reshape(1, -1), 1, H_p)],
                         axis=0).astype(jnp.float32)                   # (2, H_p)
    w2 = _pad2(params["w2"], H_p, D_out_p).astype(jnp.bfloat16)
    b2 = _pad2(params["b2"].reshape(1, -1), 1, D_out_p).astype(jnp.float32)
    coeff = params["coeff"].reshape(1, 1).astype(jnp.float32)

    # w1 / gamma-beta index maps. When layer1 is cached, pin the h index to its last
    # value for n > 0 so these tiles are DMA'd exactly h_tiles times total (the kernel
    # body never reads them for n > 0).
    if cache_l1:
        def w1_map(n, h):
            return (0, jnp.minimum(h + n * h_tiles, h_tiles - 1))
    else:
        def w1_map(n, h):
            return (0, h)

    l1_passes = 1 if cache_l1 else n_tiles
    flops = 2 * B * D_in_p * H_p * l1_passes + 2 * B * H_p * D_out_p
    bytes_accessed = (B * D_in_p * 2 + B * D_out_p * 4                 # xm + residual x
                      + (D_in_p * H_p * 2 + 2 * H_p * 4) * l1_passes   # w1 + gamma/beta
                      + H_p * D_out_p * 2 + D_out_p * 4                # w2 + b2
                      + B * D_out_p * 4)                               # output
    cost = pl.CostEstimate(flops=flops, transcendentals=H_p * l1_passes,
                           bytes_accessed=bytes_accessed)

    kernel = functools.partial(fc2_kernel, cache_l1=cache_l1, tile_h=tile_h)
    scratch = [pltpu.VMEM((B, H_p), jnp.bfloat16)] if cache_l1 else []

    out_padded = pl.pallas_call(
        kernel,
        out_shape=jax.ShapeDtypeStruct((B, D_out_p), jnp.float32),
        grid_spec=pltpu.PrefetchScalarGridSpec(
            num_scalar_prefetch=0,
            grid=(n_tiles, h_tiles),                 # n outer, h innermost (reduction)
            in_specs=[
                pl.BlockSpec(memory_space=pltpu.MemorySpace.SMEM),       # coeff
                pl.BlockSpec((B, D_in_p), lambda n, h: (0, 0)),          # x (bf16, matmul)
                pl.BlockSpec((B, tile_n), lambda n, h: (0, n)),          # x (f32, residual)
                pl.BlockSpec((D_in_p, tile_h), w1_map),                  # w1 (pinned for n>0)
                pl.BlockSpec((2, tile_h), w1_map),                       # gamma/beta stacked
                pl.BlockSpec((tile_h, tile_n), lambda n, h: (h, n)),     # w2
                pl.BlockSpec((1, tile_n), lambda n, h: (0, n)),          # b2
            ],
            out_specs=pl.BlockSpec((B, tile_n), lambda n, h: (0, n)),
            scratch_shapes=scratch,
        ),
        compiler_params=pltpu.CompilerParams(
            dimension_semantics=(("parallel" if megacore else "arbitrary"), "arbitrary"),
            vmem_limit_bytes=vmem_limit_bytes,
        ),
        cost_estimate=cost,
        input_output_aliases={2: 0},                 # padded residual-x buffer -> output
    )(coeff, xm, x32, w1, gb, w2, b2)

    return out_padded[:, :D_out]


def init_params(key, in_dim, hid_dim1, out_dim, par):
    """Deterministic init mimicking the PyTorch module's parameter shapes."""
    k1, k2, k3, k4 = jax.random.split(key, 4)
    lim1 = 1.0 / jnp.sqrt(in_dim)
    lim2 = 1.0 / jnp.sqrt(hid_dim1)
    return {
        # weights stored transposed: [in, out]
        "w1": jax.random.uniform(k1, (in_dim, hid_dim1), jnp.float32, -lim1, lim1),
        # b1 is mathematically cancelled by train-mode BatchNorm; kept only for the
        # pure-f32 PyTorch-faithful reference, never passed to the kernel.
        "b1": jax.random.uniform(k2, (1, hid_dim1), jnp.float32, -lim1, lim1),
        "gamma": jnp.ones((1, hid_dim1), jnp.float32),   # BatchNorm1d weight
        "beta": jnp.zeros((1, hid_dim1), jnp.float32),   # BatchNorm1d bias
        "w2": jax.random.uniform(k3, (hid_dim1, out_dim), jnp.float32, -lim2, lim2),
        "b2": jax.random.uniform(k4, (1, out_dim), jnp.float32, -lim2, lim2),
        "coeff": jnp.array([par], jnp.float32),
    }


def reference_forward_f32(x, p):
    """Pure-JAX f32 reference of the PyTorch forward (train-mode BatchNorm1d, with b1)."""
    h = x @ p["w1"] + p["b1"]
    mean = jnp.mean(h, axis=0, keepdims=True)
    var = jnp.mean((h - mean) ** 2, axis=0, keepdims=True)
    h = (h - mean) * jax.lax.rsqrt(var + BN_EPS) * p["gamma"] + p["beta"]
    h = jnp.maximum(h, 0.0)
    y = h @ p["w2"] + p["b2"]
    c = p["coeff"][0]
    return c * y + (1.0 - c) * x


def reference_forward_mixed(x, p):
    """Same math through the kernel's path (no b1, bf16 matmul operands, f32 acc,
    one-pass BN stats folded into one affine) for a tight numerical comparison."""
    a = jnp.dot(x.astype(jnp.bfloat16), p["w1"].astype(jnp.bfloat16),
                preferred_element_type=jnp.float32)
    mean = jnp.mean(a, axis=0, keepdims=True)
    var = jnp.maximum(jnp.mean(a * a, axis=0, keepdims=True) - mean * mean, 0.0)
    scale = p["gamma"] * jax.lax.rsqrt(var + BN_EPS)
    shift = p["beta"] - mean * scale
    h = jnp.maximum(a * scale + shift, 0.0)
    y = jnp.dot(h.astype(jnp.bfloat16), p["w2"].astype(jnp.bfloat16),
                preferred_element_type=jnp.float32) + p["b2"]
    c = p["coeff"][0]
    return x + c * (y - x)


if __name__ == "__main__":
    key = jax.random.PRNGKey(0)
    k_x, k_p = jax.random.split(key)

    # Small but multi-tile-capable shapes: padded dims are multiples of 128, and the
    # forced 128x128 tiling below gives n_tiles=2, h_tiles=3 so the layer1 cache,
    # pinned w1 DMA, per-n epilogue and megacore path are all exercised.
    B, in_dim, hid_dim1, out_dim, par = 8, 256, 384, 256, 0.7
    params = init_params(k_p, in_dim, hid_dim1, out_dim, par)
    x = jax.random.normal(k_x, (B, in_dim), jnp.float32)

    fc2_auto = jax.jit(fully_connected2)
    fc2_tiled = jax.jit(functools.partial(fully_connected2, tile_h=128, tile_n=128))
    fc2_mega = jax.jit(functools.partial(fully_connected2, tile_h=128, tile_n=128,
                                         megacore=True))

    out_auto = jax.block_until_ready(fc2_auto(x, params))
    out_tiled = jax.block_until_ready(fc2_tiled(x, params))
    out_mega = jax.block_until_ready(fc2_mega(x, params))

    assert out_auto.shape == (B, out_dim)
    assert out_tiled.shape == (B, out_dim)
    assert out_mega.shape == (B, out_dim)

    ref_mixed = reference_forward_mixed(x, params)
    ref_f32 = reference_forward_f32(x, params)

    for out in (out_auto, out_tiled, out_mega):
        assert jnp.allclose(out, ref_mixed, atol=5e-3, rtol=5e-3), \
            "mismatch vs mixed-precision reference"
        assert jnp.allclose(out, ref_f32, atol=5e-2, rtol=5e-2), \
            "mismatch vs f32 reference"
    assert jnp.allclose(out_auto, out_tiled, atol=2e-3, rtol=2e-3)
    assert jnp.allclose(out_tiled, out_mega, atol=2e-3, rtol=2e-3)

    print("KERNEL_OK")
</pallas_src>

<mosaic_0001>
module attributes {stable_mosaic.version = 11 : i64} {
  func.func @fc2_kernel(%arg0: i32, %arg1: i32, %arg2: memref<1x1xf32, #tpu.memory_space<smem>>, %arg3: memref<8x256xbf16, #tpu.memory_space<vmem>>, %arg4: memref<8x256xf32, #tpu.memory_space<vmem>>, %arg5: memref<256x128xbf16, #tpu.memory_space<vmem>>, %arg6: memref<2x128xf32, #tpu.memory_space<vmem>>, %arg7: memref<128x256xbf16, #tpu.memory_space<vmem>>, %arg8: memref<1x256xf32, #tpu.memory_space<vmem>>, %arg9: memref<8x256xf32, #tpu.memory_space<vmem>>, %arg10: memref<8x384xbf16, #tpu.memory_space<vmem>>) attributes {dimension_semantics = [#tpu.dimension_semantics<arbitrary>, #tpu.dimension_semantics<arbitrary>], iteration_bounds = array<i64: 1, 3>, scalar_prefetch = 0 : i64, scratch_operands = 1 : i64, tpu.core_type = #tpu.core_type<tc>, window_params = [{transform_indices = @transform_0, window_bounds = array<i64: 1, 1>}, {pipeline_mode = #tpu.pipeline_mode<synchronous>, transform_indices = @transform_1, window_bounds = array<i64: 8, 256>}, {transform_indices = @transform_2, window_bounds = array<i64: 8, 256>}, {transform_indices = @transform_3, window_bounds = array<i64: 256, 128>}, {transform_indices = @transform_4, window_bounds = array<i64: 2, 128>}, {transform_indices = @transform_5, window_bounds = array<i64: 128, 256>}, {transform_indices = @transform_6, window_bounds = array<i64: 1, 256>}, {transform_indices = @transform_7, window_bounds = array<i64: 8, 256>}]} {
    %c0_i32 = arith.constant 0 : i32
    %0 = arith.cmpi eq, %arg1, %c0_i32 : i32
    %1 = arith.extui %0 : i1 to i32
    %c0_i32_0 = arith.constant 0 : i32
    %2 = arith.cmpi ne, %1, %c0_i32_0 : i32
    scf.if %2 {
      %c0_10 = arith.constant 0 : index
      %c0_11 = arith.constant 0 : index
      %18 = vector.load %arg8[%c0_10, %c0_11] : memref<1x256xf32, #tpu.memory_space<vmem>>, vector<1x256xf32>
      %19 = vector.shape_cast %18 : vector<1x256xf32> to vector<1x256xf32>
      %20 = vector.broadcast %19 : vector<1x256xf32> to vector<8x256xf32>
      %c0_12 = arith.constant 0 : index
      %c0_13 = arith.constant 0 : index
      %21 = vector.load %arg9[%c0_12, %c0_13] : memref<8x256xf32, #tpu.memory_space<vmem>>, vector<8x256xf32>
      tpu.vector_store %arg9[%c0_12, %c0_13], %20 {strides = array<i32>} : memref<8x256xf32, #tpu.memory_space<vmem>>, vector<8x256xf32>,
    } else {
    }
    %c128_i32 = arith.constant 128 : i32
    %3 = arith.muli %arg1, %c128_i32 : i32
    %4 = tpu.assume_multiple %3, 128 : i32
    %c0_i32_1 = arith.constant 0 : i32
    %5 = arith.cmpi eq, %arg0, %c0_i32_1 : i32
    %6 = arith.extui %5 : i1 to i32
    %c0_i32_2 = arith.constant 0 : i32
    %7 = arith.cmpi ne, %6, %c0_i32_2 : i32
    scf.if %7 {
      %c0_10 = arith.constant 0 : index
      %c0_11 = arith.constant 0 : index
      %18 = vector.load %arg3[%c0_10, %c0_11] : memref<8x256xbf16, #tpu.memory_space<vmem>>, vector<8x256xbf16>
      %c0_12 = arith.constant 0 : index
      %c0_13 = arith.constant 0 : index
      %19 = vector.load %arg5[%c0_12, %c0_13] : memref<256x128xbf16, #tpu.memory_space<vmem>>, vector<256x128xbf16>
      %cst_14 = arith.constant dense<0.000000e+00> : vector<8x128xf32>
      %20 = tpu.matmul %18, %19, %cst_14 {dimension_numbers = #tpu.dot_dimension_numbers<[1], [0], [0], [1], [0, 0, 1, 1], [], []>} : vector<8x256xbf16>, vector<256x128xbf16>, vector<8x128xf32> -> vector<8x128xf32>
      %cst_15 = arith.constant dense<0.000000e+00> : vector<128xf32>
      %21 = vector.multi_reduction <add>, %20, %cst_15 [0] : vector<8x128xf32> to vector<128xf32>
      %22 = vector.shape_cast %21 : vector<128xf32> to vector<1x128xf32>
      %cst_16 = arith.constant 8.000000e+00 : f32
      %23 = vector.broadcast %cst_16 : f32 to vector<1x128xf32>
      %24 = arith.divf %22, %23 : vector<1x128xf32>
      %25 = arith.mulf %20, %20 : vector<8x128xf32>
      %cst_17 = arith.constant dense<0.000000e+00> : vector<128xf32>
      %26 = vector.multi_reduction <add>, %25, %cst_17 [0] : vector<8x128xf32> to vector<128xf32>
      %27 = vector.shape_cast %26 : vector<128xf32> to vector<1x128xf32>
      %cst_18 = arith.constant 8.000000e+00 : f32
      %28 = vector.broadcast %cst_18 : f32 to vector<1x128xf32>
      %29 = arith.divf %27, %28 : vector<1x128xf32>
      %30 = arith.mulf %24, %24 : vector<1x128xf32>
      %31 = arith.subf %29, %30 : vector<1x128xf32>
      %cst_19 = arith.constant 0.000000e+00 : f32
      %32 = vector.broadcast %cst_19 : f32 to vector<1x128xf32>
      %33 = arith.maximumf %31, %32 : vector<1x128xf32>
      %cst_20 = arith.constant 9.99999974E-6 : f32
      %34 = vector.broadcast %cst_20 : f32 to vector<1x128xf32>
      %35 = arith.addf %33, %34 : vector<1x128xf32>
      %36 = math.rsqrt %35 : vector<1x128xf32>
      %c0_21 = arith.constant 0 : index
      %c0_22 = arith.constant 0 : index
      %37 = vector.load %arg6[%c0_21, %c0_22] : memref<2x128xf32, #tpu.memory_space<vmem>>, vector<2x128xf32>
      %38 = vector.extract_strided_slice %37 {offsets = [0, 0], sizes = [1, 128], strides = [1, 1]} : vector<2x128xf32> to vector<1x128xf32>
      %39 = arith.mulf %38, %36 : vector<1x128xf32>
      %40 = vector.extract_strided_slice %37 {offsets = [1, 0], sizes = [1, 128], strides = [1, 1]} : vector<2x128xf32> to vector<1x128xf32>
      %41 = arith.mulf %24, %39 : vector<1x128xf32>
      %42 = arith.subf %40, %41 : vector<1x128xf32>
      %43 = vector.broadcast %39 : vector<1x128xf32> to vector<8x128xf32>
      %44 = arith.mulf %20, %43 : vector<8x128xf32>
      %45 = vector.broadcast %42 : vector<1x128xf32> to vector<8x128xf32>
      %46 = arith.addf %44, %45 : vector<8x128xf32>
      %cst_23 = arith.constant 0.000000e+00 : f32
      %47 = vector.broadcast %cst_23 : f32 to vector<8x128xf32>
      %48 = arith.maximumf %46, %47 : vector<8x128xf32>
      %49 = arith.truncf %48 : vector<8x128xf32> to vector<8x128xbf16>
      %c0_24 = arith.constant 0 : index
      %50 = arith.index_cast %4 : i32 to index
      %51 = vector.load %arg10[%c0_24, %50] : memref<8x384xbf16, #tpu.memory_space<vmem>>, vector<8x128xbf16>
      tpu.vector_store %arg10[%c0_24, %50], %49 {strides = array<i32>} : memref<8x384xbf16, #tpu.memory_space<vmem>>, vector<8x128xbf16>,
    } else {
    }
    %c0 = arith.constant 0 : index
    %8 = arith.index_cast %4 : i32 to index
    %9 = vector.load %arg10[%c0, %8] : memref<8x384xbf16, #tpu.memory_space<vmem>>, vector<8x128xbf16>
    %c0_3 = arith.constant 0 : index
    %c0_4 = arith.constant 0 : index
    %10 = vector.load %arg9[%c0_3, %c0_4] : memref<8x256xf32, #tpu.memory_space<vmem>>, vector<8x256xf32>
    %c0_5 = arith.constant 0 : index
    %c0_6 = arith.constant 0 : index
    %11 = vector.load %arg7[%c0_5, %c0_6] : memref<128x256xbf16, #tpu.memory_space<vmem>>, vector<128x256xbf16>
    %cst = arith.constant dense<0.000000e+00> : vector<8x256xf32>
    %12 = tpu.matmul %9, %11, %cst {dimension_numbers = #tpu.dot_dimension_numbers<[1], [0], [0], [1], [0, 0, 1, 1], [], []>} : vector<8x128xbf16>, vector<128x256xbf16>, vector<8x256xf32> -> vector<8x256xf32>
    %13 = arith.addf %10, %12 : vector<8x256xf32>
    %c0_7 = arith.constant 0 : index
    %c0_8 = arith.constant 0 : index
    %14 = vector.load %arg9[%c0_7, %c0_8] : memref<8x256xf32, #tpu.memory_space<vmem>>, vector<8x256xf32>
    tpu.vector_store %arg9[%c0_7, %c0_8], %13 {strides = array<i32>} : memref<8x256xf32, #tpu.memory_space<vmem>>, vector<8x256xf32>,
    %c2_i32 = arith.constant 2 : i32
    %15 = arith.cmpi eq, %arg1, %c2_i32 : i32
    %16 = arith.extui %15 : i1 to i32
    %c0_i32_9 = arith.constant 0 : i32
    %17 = arith.cmpi ne, %16, %c0_i32_9 : i32
    scf.if %17 {
      %c0_10 = arith.constant 0 : index
      %c0_11 = arith.constant 0 : index
      %18 = memref.load %arg2[%c0_10, %c0_11] : memref<1x1xf32, #tpu.memory_space<smem>>
      %c0_12 = arith.constant 0 : index
      %c0_13 = arith.constant 0 : index
      %19 = vector.load %arg4[%c0_12, %c0_13] : memref<8x256xf32, #tpu.memory_space<vmem>>, vector<8x256xf32>
      %c0_14 = arith.constant 0 : index
      %c0_15 = arith.constant 0 : index
      %20 = vector.load %arg9[%c0_14, %c0_15] : memref<8x256xf32, #tpu.memory_space<vmem>>, vector<8x256xf32>
      %21 = arith.subf %20, %19 : vector<8x256xf32>
      %22 = vector.broadcast %18 : f32 to vector<8x256xf32>
      %23 = arith.mulf %22, %21 : vector<8x256xf32>
      %24 = arith.addf %19, %23 : vector<8x256xf32>
      %c0_16 = arith.constant 0 : index
      %c0_17 = arith.constant 0 : index
      %25 = vector.load %arg9[%c0_16, %c0_17] : memref<8x256xf32, #tpu.memory_space<vmem>>, vector<8x256xf32>
      tpu.vector_store %arg9[%c0_16, %c0_17], %24 {strides = array<i32>} : memref<8x256xf32, #tpu.memory_space<vmem>>, vector<8x256xf32>,
    } else {
    }
    return
  }
  func.func @transform_0(%arg0: i32, %arg1: i32) -> (i32, i32) {
    %c0_i32 = arith.constant 0 : i32
    %c0_i32_0 = arith.constant 0 : i32
    %c0_i32_1 = arith.constant 0 : i32
    return %c0_i32, %c0_i32_0 : i32, i32
  }
  func.func @transform_1(%arg0: i32, %arg1: i32) -> (i32, i32) {
    %c0_i32 = arith.constant 0 : i32
    %c0_i32_0 = arith.constant 0 : i32
    %c0_i32_1 = arith.constant 0 : i32
    return %c0_i32, %c0_i32_0 : i32, i32
  }
  func.func @transform_2(%arg0: i32, %arg1: i32) -> (i32, i32) {
    %c0_i32 = arith.constant 0 : i32
    %c0_i32_0 = arith.constant 0 : i32
    return %c0_i32, %arg0 : i32, i32
  }
  func.func @transform_3(%arg0: i32, %arg1: i32) -> (i32, i32) {
    %c3_i32 = arith.constant 3 : i32
    %0 = arith.muli %arg0, %c3_i32 : i32
    %1 = arith.addi %arg1, %0 : i32
    %c2_i32 = arith.constant 2 : i32
    %2 = arith.minsi %1, %c2_i32 : i32
    %c0_i32 = arith.constant 0 : i32
    %c0_i32_0 = arith.constant 0 : i32
    return %c0_i32, %2 : i32, i32
  }
  func.func @transform_4(%arg0: i32, %arg1: i32) -> (i32, i32) {
    %c3_i32 = arith.constant 3 : i32
    %0 = arith.muli %arg0, %c3_i32 : i32
    %1 = arith.addi %arg1, %0 : i32
    %c2_i32 = arith.constant 2 : i32
    %2 = arith.minsi %1, %c2_i32 : i32
    %c0_i32 = arith.constant 0 : i32
    %c0_i32_0 = arith.constant 0 : i32
    return %c0_i32, %2 : i32, i32
  }
  func.func @transform_5(%arg0: i32, %arg1: i32) -> (i32, i32) {
    %c0_i32 = arith.constant 0 : i32
    return %arg1, %arg0 : i32, i32
  }
  func.func @transform_6(%arg0: i32, %arg1: i32) -> (i32, i32) {
    %c0_i32 = arith.constant 0 : i32
    %c0_i32_0 = arith.constant 0 : i32
    return %c0_i32, %arg0 : i32, i32
  }
  func.func @transform_7(%arg0: i32, %arg1: i32) -> (i32, i32) {
    %c0_i32 = arith.constant 0 : i32
    %c0_i32_0 = arith.constant 0 : i32
    return %c0_i32, %arg0 : i32, i32
  }
}

</mosaic_0001>

<bundles_post_ra>
// kernel: fully_connected2.1
= control target key start
LH: loop header
LB: loop body
LE: loop exit
PB: predicated region body
PF: predicated region fallthrough
CT: control target
= control target key end

     0   :  { %s1729_s0 = inlined_call_operand.<no memory space> [shape: f32[1,1], index: 0, kind: input, shape index: {}]   ;;  %s1730_s1 = inlined_call_operand.vmem [shape: bf16[8,256], index: 1, kind: input, shape index: {}]   ;;  %s1731_s2 = inlined_call_operand.hbm [shape: f32[8,256], index: 2, kind: input, shape index: {}, may-alias: {2,7}]   ;;  %s1732_s3 = inlined_call_operand.vmem [shape: bf16[256,384], index: 3, kind: input, shape index: {}]   ;;  %s1733_s4 = inlined_call_operand.vmem [shape: f32[2,384], index: 4, kind: input, shape index: {}]   ;;  %s1734_s5 = inlined_call_operand.vmem [shape: bf16[384,256], index: 5, kind: input, shape index: {}]   ;;  %s1735_s6 = inlined_call_operand.vmem [shape: f32[1,256], index: 6, kind: input, shape index: {}]   ;;  %s1736_s7 = inlined_call_operand.hbm [shape: f32[8,256], index: 7, kind: output, shape index: {}, may-alias: {2,7}]  }
   0x1   :  { %12 = sst [smem:[#allocation3]] %s1729_s0 }
   0x2   :  { %13 = vsyncpa [#allocation5], 0 }
   0x3   :  { %14 = vsyncpa [#allocation6], 0  ;;  %s1463_s26 = smov 0   ;;  %s1465_s27 = smov 0  }
   0x4   :  { %s1467_s28 = smov 0   ;;  %s1469_s29 = smov 0  }
   0x5   :  { %s1471_s30 = smov 0  }
   0x6 LB: > { %s1129_s0 = sadd.s32 4294967295, %s1415_s30   ;;  %s29_s8 = sadd.s32 1, %s1411_s29  ;;  %s1415_s30 = sphi %s1471_s30, %s20_s30   ;;  %s1411_s29 = sphi %s1469_s29, %s1751_s29   ;;  %s1407_s28 = sphi %s1467_s28, %s1750_s28   ;;  %s1403_s27 = sphi %s1465_s27, %s1749_s27   ;;  %s1399_s26 = sphi %s1463_s26, %s1748_s26  }
   0x7   : > { %p30_p0 = scmp.ge.s32.totalorder %s29_s8, 3  ;;  %p106_p1 = scmp.lt.s32.totalorder %s1411_s29, 2 }
   0x8   : > { %s115_s9 = sadd.s32 1, %s1403_s27  ;;  %p122_p2 = scmp.ne.s32.totalorder %s1403_s27, %s1399_s26 }
   0x9   : > { %s1753_s8 = smov (%p30_p0, %s29_s8), 0  ;;  %p123_p4 = scmp.eq.s32.totalorder %s1415_s30, 0 }
   0xa   : > { %s1497_s10 = scalar_select %p106_p1, %s1411_s29, 2 }
   0xb   : > { %p110_p3 = scmp.lt.s32.totalorder %s1753_s8, 2  ;;  %p1130_p5 = scmp.ge.s32.totalorder %s1415_s30, 1 }
   0xc   : > { %p253_p6 = scmp.lt.s32.totalorder %s1415_s30, 4  ;;  %p1504_p7 = por %p123_p4, %p122_p2 }
   0xd   : > { %s111_s11 = scalar_select %p110_p3, %s1753_s8, 2 }
   0xe   : > { %s1740_s12 = scalar_select %p1504_p7, 1, 0 }
   0xf   : > { %p1508_p8 = pnand %p1130_p5, %p253_p6  ;;  %s112_s14 = ssub.s32 %s1497_s10, %s111_s11 }
  0x10   : > { %p113_p9 = scmp.eq.s32.totalorder %s112_s14, 0  ;;  %p1517_p11 = scmp.eq.s32.totalorder %s1129_s0, 0 }
  0x11   : > { %s1741_s13 = scalar_select %p1508_p8, 1, 0 }
  0x12   : > { %p1220_p10 = pneg %p1508_p8  ;;  %s1417_s17 = smov [#allocation4]  }
  0x13   : > { %s1742_s15 = scalar_select %p1517_p11, 1, 0 }
  0x14   : > { %s1522_s16 = scalar_select %p113_p9, %s1403_s27, %s115_s9  }
  0x15   : > { %s275_s18 = sshll.u32 %s1417_s17, 4  ;;  %p1526_p12 = pnand %p1517_p11, %p1220_p10  ;;  %s276_s18 = int_to_ptr.vmem [resolvable:$true] %s275_s18 }
  0x16   : > { %s1315_s22 = scalar_lea.hbm %s1731_s2, 256 }
  0x17   : > { %p1316_p13 = scmp.ne.s32.totalorder %s1731_s2, %s1315_s22  ;;  %p1317_p0 = pneg %p1526_p12 }
  0x18   : > { %p1322_p3 = scmp.lt.u32.totalorder %s1315_s22, %s1731_s2 }
  0x19   : > { %p1318_p1 = pnand %p1317_p0, %p1316_p13 }
  0x1b   : > { %p1319_p2 = pneg %p1318_p1 }
  0x1d   : > { %p1324_p4 = pnand %p1322_p3, %p1319_p2 }
  0x1f   : > { %1327 = shalt.err (!%p1324_p4)
}
  0x20   : > { %s1328_s11 = scalar_lea.vmem %s276_s18, 256  ;;  %p1336_p10 = scmp.lt.s32.totalorder %s276_s18, %s276_s18 }
  0x21   : > { %p1329_p5 = scmp.ne.s32.totalorder %s276_s18, %s1328_s11  ;;  %p1337_p11 = scmp.lt.s32.totalorder %s1328_s11, %s1328_s11 }
  0x23   : > { %p1331_p6 = pnand %p1329_p5, %p1317_p0  ;;  %p1338_p8 = por %p1337_p11, %p1336_p10 }
  0x25   : > { %p1332_p9 = pneg %p1331_p6 }
  0x27   : > { %p1339_p7 = pnand %p1338_p8, %p1332_p9 }
  0x29   : > { %1342 = shalt.err (!%p1339_p7)
}
  0x2a   : > { %1223 = dma.hbm_to_vmem [thread:$0]  (!%p1526_p12), %s1731_s2, 256, %s276_s18, [#allocation5]  }
  0x2b   : > { %p1133_p13 = scmp.ge.s32.totalorder %s1415_s30, 3 }
  0x2c   : > { %p1744_p1 = scmp.ne.s32.totalorder (!%p1133_p13), %s1740_s12, 0 }
  0x2d   : > { %290 = sbr.rel (%p1133_p13) target bundleno = 77 (0x4d), region = 32 }
  0x34   : > { %293 = sbr.rel (!%p1744_p1) target bundleno = 77 (0x4d), region = 36  ;;  %s295_s20 = sand.u32 (%p1744_p1), 1, %s1403_s27  }
  0x35   : > { %s1135_s21 = sshll.u32 (%p1744_p1), %s1497_s10, 2  ;;  %s1134_s22 = sshll.u32 (%p1744_p1), %s295_s20, 7 }
  0x36   : > { %s1554_s25 = scalar_lea.vmem (%p1744_p1), %s1732_s3, %s1135_s21  ;;  %s1558_s12 = scalar_lea.vmem (%p1744_p1), [#allocation7], %s1134_s22 }
  0x37   : > { %v319_v0 = vld [vmem:[%s1554_s25] sm:$0xf] (%p1744_p1)  ;;  %v321_v1 = vld [vmem:[%s1554_s25 + $0xc] sm:$0xf] (%p1744_p1)  ;;  %v323_v2 = vld [vmem:[%s1554_s25 + $0x18] sm:$0xf] (%p1744_p1) }
  0x38   : > { %320 = vst [vmem:[%s1558_s12] sm:$0xf] (%p1744_p1), %v319_v0  ;;  %322 = vst [vmem:[%s1558_s12 + $0x4] sm:$0xf] (%p1744_p1), %v321_v1  ;;  %v325_v3 = vld [vmem:[%s1554_s25 + $0x24] sm:$0xf] (%p1744_p1) }
  0x39   : > { %v327_v4 = vld [vmem:[%s1554_s25 + $0x30] sm:$0xf] (%p1744_p1)  ;;  %324 = vst [vmem:[%s1558_s12 + $0x8] sm:$0xf] (%p1744_p1), %v323_v2  ;;  %326 = vst [vmem:[%s1558_s12 + $0xc] sm:$0xf] (%p1744_p1), %v325_v3 }
  0x3a   : > { %328 = vst [vmem:[%s1558_s12 + $0x10] sm:$0xf] (%p1744_p1), %v327_v4  ;;  %v329_v5 = vld [vmem:[%s1554_s25 + $0x3c] sm:$0xf] (%p1744_p1)  ;;  %v331_v6 = vld [vmem:[%s1554_s25 + $0x48] sm:$0xf] (%p1744_p1) }
  0x3b   : > { %v333_v7 = vld [vmem:[%s1554_s25 + $0x54] sm:$0xf]  ;;  %330 = vst [vmem:[%s1558_s12 + $0x14] sm:$0xf] %v329_v5  ;;  %332 = vst [vmem:[%s1558_s12 + $0x18] sm:$0xf] %v331_v6 }
  0x3c   : > { %334 = vst [vmem:[%s1558_s12 + $0x1c] sm:$0xf] %v333_v7  ;;  %v335_v8 = vld [vmem:[%s1554_s25 + $0x60] sm:$0xf]  ;;  %v337_v9 = vld [vmem:[%s1554_s25 + $0x6c] sm:$0xf] }
  0x3d   : > { %v339_v10 = vld [vmem:[%s1554_s25 + $0x78] sm:$0xf]  ;;  %336 = vst [vmem:[%s1558_s12 + $0x20] sm:$0xf] %v335_v8  ;;  %338 = vst [vmem:[%s1558_s12 + $0x24] sm:$0xf] %v337_v9 }
  0x3e   : > { %340 = vst [vmem:[%s1558_s12 + $0x28] sm:$0xf] %v339_v10  ;;  %v341_v11 = vld [vmem:[%s1554_s25 + $0x84] sm:$0xf]  ;;  %v343_v12 = vld [vmem:[%s1554_s25 + $0x90] sm:$0xf] }
  0x3f   : > { %v345_v13 = vld [vmem:[%s1554_s25 + $0x9c] sm:$0xf]  ;;  %342 = vst [vmem:[%s1558_s12 + $0x2c] sm:$0xf] %v341_v11  ;;  %344 = vst [vmem:[%s1558_s12 + $0x30] sm:$0xf] %v343_v12 }
  0x40   : > { %346 = vst [vmem:[%s1558_s12 + $0x34] sm:$0xf] %v345_v13  ;;  %v347_v14 = vld [vmem:[%s1554_s25 + $0xa8] sm:$0xf]  ;;  %v349_v15 = vld [vmem:[%s1554_s25 + $0xb4] sm:$0xf] }
  0x41   : > { %v351_v16 = vld [vmem:[%s1554_s25 + $0xc0] sm:$0xf]  ;;  %348 = vst [vmem:[%s1558_s12 + $0x38] sm:$0xf] %v347_v14  ;;  %350 = vst [vmem:[%s1558_s12 + $0x3c] sm:$0xf] %v349_v15 }
  0x42   : > { %352 = vst [vmem:[%s1558_s12 + $0x40] sm:$0xf] %v351_v16  ;;  %v353_v17 = vld [vmem:[%s1554_s25 + $0xcc] sm:$0xf]  ;;  %v355_v18 = vld [vmem:[%s1554_s25 + $0xd8] sm:$0xf] }
  0x43   : > { %v357_v19 = vld [vmem:[%s1554_s25 + $0xe4] sm:$0xf]  ;;  %354 = vst [vmem:[%s1558_s12 + $0x44] sm:$0xf] %v353_v17  ;;  %356 = vst [vmem:[%s1558_s12 + $0x48] sm:$0xf] %v355_v18 }
  0x44   : > { %358 = vst [vmem:[%s1558_s12 + $0x4c] sm:$0xf] %v357_v19  ;;  %v359_v20 = vld [vmem:[%s1554_s25 + $0xf0] sm:$0xf]  ;;  %v361_v21 = vld [vmem:[%s1554_s25 + $0xfc] sm:$0xf] }
  0x45   : > { %v363_v22 = vld [vmem:[%s1554_s25 + $0x108] sm:$0xf]  ;;  %360 = vst [vmem:[%s1558_s12 + $0x50] sm:$0xf] %v359_v20  ;;  %362 = vst [vmem:[%s1558_s12 + $0x54] sm:$0xf] %v361_v21 }
  0x46   : > { %364 = vst [vmem:[%s1558_s12 + $0x58] sm:$0xf] %v363_v22  ;;  %v365_v23 = vld [vmem:[%s1554_s25 + $0x114] sm:$0xf]  ;;  %v367_v24 = vld [vmem:[%s1554_s25 + $0x120] sm:$0xf] }
  0x47   : > { %v369_v25 = vld [vmem:[%s1554_s25 + $0x12c] sm:$0xf]  ;;  %366 = vst [vmem:[%s1558_s12 + $0x5c] sm:$0xf] %v365_v23  ;;  %368 = vst [vmem:[%s1558_s12 + $0x60] sm:$0xf] %v367_v24 }
  0x48   : > { %370 = vst [vmem:[%s1558_s12 + $0x64] sm:$0xf] %v369_v25  ;;  %v371_v26 = vld [vmem:[%s1554_s25 + $0x138] sm:$0xf]  ;;  %v373_v27 = vld [vmem:[%s1554_s25 + $0x144] sm:$0xf] }
  0x49   : > { %v375_v28 = vld [vmem:[%s1554_s25 + $0x150] sm:$0xf]  ;;  %372 = vst [vmem:[%s1558_s12 + $0x68] sm:$0xf] %v371_v26  ;;  %374 = vst [vmem:[%s1558_s12 + $0x6c] sm:$0xf] %v373_v27 }
  0x4a   : > { %376 = vst [vmem:[%s1558_s12 + $0x70] sm:$0xf] %v375_v28  ;;  %v377_v29 = vld [vmem:[%s1554_s25 + $0x15c] sm:$0xf]  ;;  %v379_v30 = vld [vmem:[%s1554_s25 + $0x168] sm:$0xf] }
  0x4b   : > { %v381_v31 = vld [vmem:[%s1554_s25 + $0x174] sm:$0xf]  ;;  %378 = vst [vmem:[%s1558_s12 + $0x74] sm:$0xf] %v377_v29  ;;  %380 = vst [vmem:[%s1558_s12 + $0x78] sm:$0xf] %v379_v30 }
  0x4c   : > { %382 = vst [vmem:[%s1558_s12 + $0x7c] sm:$0xf] %v381_v31 }
  0x4d PF: > { %p1745_p7 = scmp.ne.s32.totalorder %s1741_s13, 0 }
  0x4e   : > { %p1746_p8 = scmp.ne.s32.totalorder (!%p1745_p7), %s1742_s15, 0 }
  0x4f   : > { %502 = sbr.rel (%p1745_p7) target bundleno = 661 (0x295), region = 85 }
  0x56   : > { %1390 = dma.done.wait (%p1746_p8), [#allocation5], 256  }
  0x57   : > { %1392 = vsyncadd (%p1746_p8), [#allocation5], 4294967040  ;;  %s509_s10 = sand.u32 1, %s1399_s26   ;;  %p564_p11 = scmp.lt.s32.totalorder %s1407_s28, 2 }
  0x58   : > { %s1138_s18 = sshll.u32 %s509_s10, 7  ;;  %s1143_s19 = sshll.u32 %s1407_s28, 4 }
  0x59   : > { %p576_p12 = scmp.lt.s32.totalorder %s1143_s19, 47  ;;  %s1642_s26 = scalar_lea.vmem [#allocation7], %s1138_s18 }
  0x5a   : > { %s565_s9 = scalar_select %p564_p11, %s1407_s28, 2 }
  0x5b   : > { %s1755_s19 = smov (!%p576_p12, %s1143_s19), 47  ;;  %p1146_p0 = scmp.ne.s32.totalorder %s1407_s28, 0 }
  0x5c   : > { %s1757_s9 = smov (!%p564_p11, %s565_s9), 2  ;;  %s1189_s13 = sshll.u32 %s1755_s19, 3  ;;  %v599_v32 = vlaneseq (!%p1146_p0)  ;;  %v597_v34 = vld [vmem:[%s1735_s6] sm:$0x3] (!%p1146_p0) }
  0x5d   : > { %s1142_s11 = sshll.u32 %s1757_s9, 1  ;;  %s1635_s20 = scalar_lea.vmem %s1734_s5, %s1189_s13 }
  0x5e   : > { %s1640_s22 = scalar_lea.vmem %s1733_s4, %s1142_s11  ;;  %596 = sbr.rel (%p1146_p0) target bundleno = 101 (0x65), region = 97  ;;  %v600_v33 = vshrl.u32 (!%p1146_p0), %v599_v32, 7 }
  0x60   : > { %v601_v35 = vsub.s32 (!%p1146_p0), 0, %v600_v33  ;;  %v605_v36 = vsub.s32 (!%p1146_p0), 1, %v600_v33 }
  0x62   : > { %v602_v37 = vrot.slane (!%p1146_p0), %v597_v34, %v601_v35  ;;  %v606_v38 = vrot.slane (!%p1146_p0), %v597_v34, %v605_v36 }
  0x64   : > { %609 = vst [vmem:[#allocation8] sm:$0xff] (!%p1146_p0), %v602_v37  ;;  %610 = vst [vmem:[#allocation8 + $0x8] sm:$0xff] (!%p1146_p0), %v606_v38 }
  0x65 PF: > { %v1271_v39 = vld [vmem:[%s1642_s26 + $0x40] sm:$0xff]   ;;  %v1273_v41 = vld [vmem:[%s1642_s26 + $0x48] sm:$0xff]   ;;  %v1275_v43 = vld [vmem:[%s1642_s26 + $0x50] sm:$0xff]   ;;  %v1418_v5 = vmov 0   ;;  %v820_v35 = vlaneseq  ;;  %s1147_s10 = sshll.u32 %s1407_s28, 7  ;;  %p1184_p2 = scmp.ne.s32.totalorder %s1407_s28, 2 }
  0x66   : > { %v1272_v40 = vld [vmem:[%s1642_s26] sm:$0xff]   ;;  %1190 = vmatprep.subr.bf16.mxu0 %v1271_v39  ;;  %v1274_v42 = vld [vmem:[%s1642_s26 + $0x8] sm:$0xff]   ;;  %v1276_v44 = vld [vmem:[%s1642_s26 + $0x10] sm:$0xff]   ;;  %972 = vmatprep.mubr.bf16.mxu1 %v1418_v5  ;;  %s832_s18 = sshra.s32 %s1147_s10, 7  ;;  %s989_s13 = sld [smem:[#allocation3]] (!%p1184_p2) }
  0x67   : > { %1191 = vmatpush3.bf16.msra.mxu0 %v1272_v40  ;;  %v1277_v45 = vld [vmem:[%s1642_s26 + $0x58] sm:$0xff]   ;;  %v1279_v47 = vld [vmem:[%s1642_s26 + $0x60] sm:$0xff]   ;;  %v1281_v49 = vld [vmem:[%s1642_s26 + $0x68] sm:$0xff]   ;;  %v821_v36 = vshrl.u32 %v820_v35, 7  ;;  %s1166_s19 = sshll.u32 %s832_s18, 2 }
  0x68   : > { %1192 = vmatprep.subr.bf16.mxu0 %v1273_v41  ;;  %v1278_v46 = vld [vmem:[%s1642_s26 + $0x18] sm:$0xff]   ;;  %v1280_v48 = vld [vmem:[%s1642_s26 + $0x20] sm:$0xff]   ;;  %v1282_v51 = vld [vmem:[%s1642_s26 + $0x28] sm:$0xff]   ;;  %s835_s9 = scalar_lea.vmem [#allocation2], %s1166_s19 }
  0x69   : > { %v616_v50 = vld [vmem:[%s1730_s1] sm:$0xff]  ;;  %v1283_v53 = vld [vmem:[%s1642_s26 + $0x70] sm:$0xff]   ;;  %v1285_v55 = vld [vmem:[%s1642_s26 + $0x78] sm:$0xff]   ;;  %v822_v40 = vsub.s32 0, %v821_v36 }
  0x6a   : > { %v1149_v52 = vcombine.high %v616_v50, %v616_v50  ;;  %v1284_v54 = vld [vmem:[%s1642_s26 + $0x30] sm:$0xff]   ;;  %v1286_v56 = vld [vmem:[%s1642_s26 + $0x38] sm:$0xff]   ;;  %v1148_v57 = vcombine.low %v616_v50, %v616_v50  ;;  %v1291_v59 = vld [vmem:[%s1635_s20] ss:$8 sps:$4 sm:$0xff]  }
  0x6b   : > { %1193 = vmatpush3.bf16.msra.mxu0 %v1274_v42  ;;  %v1289_v58 = vld [vmem:[%s1635_s20 + $0x4] ss:$8 sps:$4 sm:$0xff]   ;;  %v1292_v60 = vld [vmem:[%s1635_s20 + $0x14] ss:$8 sps:$4 sm:$0xff]   ;;  %v1294_v61 = vld [vmem:[%s1635_s20 + $0x10] ss:$8 sps:$4 sm:$0xff]  }
  0x6c   : > { %1194 = vmatprep.subr.bf16.mxu0 %v1275_v43  ;;  %784 = vmatprep.mubr.bf16.mxu0 %v1149_v52  ;;  %v1295_v62 = vld [vmem:[%s1635_s20 + $0x24] ss:$8 sps:$4 sm:$0xff]   ;;  %v1297_v63 = vld [vmem:[%s1635_s20 + $0x20] ss:$8 sps:$4 sm:$0xff]   ;;  %v1298_v0 = vld [vmem:[%s1635_s20 + $0x34] ss:$8 sps:$4 sm:$0xff]  }
  0x6d   : > { %940 = vmatprep.subr.bf16.mxu1 %v1289_v58  ;;  %v1300_v1 = vld [vmem:[%s1635_s20 + $0x30] ss:$8 sps:$4 sm:$0xff]   ;;  %v1301_v2 = vld [vmem:[%s1635_s20 + $0x44] ss:$8 sps:$4 sm:$0xff]   ;;  %v1303_v3 = vld [vmem:[%s1635_s20 + $0x40] ss:$8 sps:$4 sm:$0xff]  }
  0x6e   : > { %941 = vmatpush1.bf16.msra.mxu1 %v1291_v59  ;;  %v1304_v4 = vld [vmem:[%s1635_s20 + $0x54] ss:$8 sps:$4 sm:$0xff]   ;;  %v1306_v6 = vld [vmem:[%s1635_s20 + $0x50] ss:$8 sps:$4 sm:$0xff]   ;;  %v1307_v7 = vld [vmem:[%s1635_s20 + $0x64] ss:$8 sps:$4 sm:$0xff]  }
  0x6f   : > { %1195 = vmatpush3.bf16.msra.mxu0 %v1276_v44  ;;  %942 = vmatprep.subr.bf16.mxu1 %v1292_v60  ;;  %v1309_v8 = vld [vmem:[%s1635_s20 + $0x60] ss:$8 sps:$4 sm:$0xff]   ;;  %v1310_v9 = vld [vmem:[%s1635_s20 + $0x74] ss:$8 sps:$4 sm:$0xff]   ;;  %v1312_v10 = vld [vmem:[%s1635_s20 + $0x70] ss:$8 sps:$4 sm:$0xff]  }
  0x70   : > { %1196 = vmatprep.subr.bf16.mxu0 %v1277_v45  ;;  %v813_v37 = vld [vmem:[%s1640_s22] sm:$0x3]  ;;  %v827_v44 = vsub.s32 1, %v821_v36  ;;  %v990_v60 = vld [vmem:[#allocation4] sm:$0xff] (!%p1184_p2) }
  0x71   : > { %v842_v52 = vld [vmem:[#allocation8] sm:$0xff] }
  0x72   : > { %943 = vmatpush1.bf16.msra.mxu1 %v1294_v61 }
  0x73   : > { %1197 = vmatpush3.bf16.msra.mxu0 %v1278_v46  ;;  %944 = vmatprep.subr.bf16.mxu1 %v1295_v62  ;;  %v991_v62 = vld [vmem:[#allocation4 + $0x8] sm:$0xff] (!%p1184_p2) }
  0x74   : > { %1198 = vmatprep.subr.bf16.mxu0 %v1279_v47 }
  0x76   : > { %945 = vmatpush1.bf16.msra.mxu1 %v1297_v63 }
  0x77   : > { %1199 = vmatpush3.bf16.msra.mxu0 %v1280_v48  ;;  %946 = vmatprep.subr.bf16.mxu1 %v1298_v0 }
  0x78   : > { %1200 = vmatprep.subr.bf16.mxu0 %v1281_v49 }
  0x7a   : > { %947 = vmatpush1.bf16.msra.mxu1 %v1300_v1 }
  0x7b   : > { %1201 = vmatpush3.bf16.msra.mxu0 %v1282_v51  ;;  %948 = vmatprep.subr.bf16.mxu1 %v1301_v2  ;;  %v996_v2 = vstv (!%p1184_p2), %s989_s13 }
  0x7c   : > { %1202 = vmatprep.subr.bf16.mxu0 %v1283_v53  ;;  %v843_v53 = vld [vmem:[#allocation8 + $0x8] sm:$0xff] }
  0x7e   : > { %949 = vmatpush1.bf16.msra.mxu1 %v1303_v3 }
  0x7f   : > { %1203 = vmatpush3.bf16.msra.mxu0 %v1284_v54  ;;  %950 = vmatprep.subr.bf16.mxu1 %v1304_v4 }
  0x80   : > { %1204 = vmatprep.subr.bf16.mxu0 %v1285_v55 }
  0x82   : > { %951 = vmatpush1.bf16.msra.mxu1 %v1306_v6 }
  0x83   : > { %1205 = vmatpush3.bf16.msra.mxu0 %v1286_v56  ;;  %952 = vmatprep.subr.bf16.mxu1 %v1307_v7 }
  0x86   : > { %785 = vmatmul.mubr.bf16.vlgmr.msra.gmra.mrb[0].mxu0 %v1148_v57  ;;  %953 = vmatpush1.bf16.msra.mxu1 %v1309_v8 }
  0x87   : > { %954 = vmatprep.subr.bf16.mxu1 %v1310_v9 }
  0x8a   : > { %955 = vmatpush1.bf16.msra.mxu1 %v1312_v10 }
 0x159   : > { %v1206_v11 = vpop.f32.mrb[0].mxu0 }
 0x15a   : > { %v1207_v12 = vpop.f32.mrb[1].mxu0 }
 0x15b   : > { %v1208_v13 = vadd.f32 %v1207_v12, %v1206_v11  ;;  %v1209_v14 = vpop.f32.mrb[2].mxu0 }
 0x15c   : > { %v1210_v15 = vpop.f32.mrb[3].mxu0 }
 0x15d   : > { %v792_v16 = vrot.slane %v1208_v13, 4  ;;  %v800_v17 = vmul.f32 %v1208_v13, %v1208_v13 }
 0x15f   : > { %v793_v18 = vadd.f32 %v1208_v13, %v792_v16  ;;  %v801_v19 = vrot.slane %v800_v17, 4 }
 0x161   : > { %v794_v20 = vrot.slane %v793_v18, 2  ;;  %v802_v21 = vadd.f32 %v801_v19, %v800_v17 }
 0x163   : > { %v795_v22 = vadd.f32 %v794_v20, %v793_v18  ;;  %v803_v23 = vrot.slane %v802_v21, 2 }
 0x165   : > { %v796_v24 = vrot.slane %v795_v22, 1  ;;  %v804_v25 = vadd.f32 %v803_v23, %v802_v21 }
 0x167   : > { %v797_v26 = vadd.f32 %v796_v24, %v795_v22  ;;  %v805_v27 = vrot.slane %v804_v25, 1 }
 0x169   : > { %v799_v28 = vmul.f32 0.125, %v797_v26  ;;  %v806_v29 = vadd.f32 %v805_v27, %v804_v25 }
 0x16b   : > { %v807_v30 = vmul.f32 0.125, %v806_v29  ;;  %v808_v31 = vmul.f32 %v799_v28, %v799_v28 }
 0x16d   : > { %v809_v32 = vsub.f32 %v807_v30, %v808_v31 }
 0x16f   : > { %v810_v33 = vmax.f32 %v809_v32, 0.0 }
 0x171   : > { %v811_v34 = vadd.f32 1e-05, %v810_v33 }
 0x173   : > { %1313 = vrsqrt.f32 %v811_v34 }
 0x17d   : > { %v1314_v38 = vpop.eup %1313 }
 0x17e   : > { %v814_v39 = vmul.f32 %v1314_v38, %v813_v37 }
 0x180   : > { %v815_v41 = vmul.f32 %v814_v39, %v799_v28  ;;  %v823_v42 = vrot.slane %v814_v39, %v822_v40 }
 0x182   : > { %v817_v43 = vrot.slane %v815_v41, 7  ;;  %v824_v46 = vmul.f32 %v1208_v13, %v823_v42 }
 0x184   : > { %v819_v45 = vsub.f32 %v813_v37, %v817_v43 }
 0x186   : > { %v828_v47 = vrot.slane %v819_v45, %v827_v44 }
 0x188   : > { %v829_v48 = vadd.f32 %v828_v47, %v824_v46 }
 0x18a   : > { %v830_v49 = vmax.f32 %v829_v48, 0.0 }
 0x18c   : > { %v831_v50 = vpack.c.bf16 %v830_v49, %v830_v49 }
 0x18e   : > { %836 = vst [vmem:[%s835_s9] sm:$0xf] %v831_v50 }
 0x195   : > { %v841_v51 = vld [vmem:[%s835_s9] sm:$0xf] }
 0x196   : > { %973 = vmatmul.mubr.bf16.vlgmr.msra.gmra.mrb[0].mxu1 %v841_v51 }
 0x267   : > { %988 = sbr.rel (%p1184_p2) target bundleno = 636 (0x27c), region = 105 }
 0x269   : > { %v974_v54 = vpop.f32.mrb[0].mxu1 }
 0x26a   : > { %v981_v55 = vadd.f32 %v974_v54, %v842_v52  ;;  %v976_v56 = vpop.f32.mrb[1].mxu1 }
 0x26b   : > { %v982_v57 = vadd.f32 %v976_v56, %v843_v53  ;;  %v978_v58 = vpop.f32.mrb[2].mxu1 }
 0x26c   : > { %983 = vst [vmem:[#allocation8] sm:$0xff] %v981_v55  ;;  %v979_v59 = vpop.f32.mrb[3].mxu1 }
 0x26d   : > { %984 = vst [vmem:[#allocation8 + $0x8] sm:$0xff] %v982_v57 }
 0x273   : > { %v992_v61 = vld [vmem:[#allocation8] sm:$0xff] }
 0x274   : > { %v993_v63 = vld [vmem:[#allocation8 + $0x8] sm:$0xff]  ;;  %v994_v0 = vsub.f32 %v992_v61, %v990_v60 }
 0x275   : > { %v995_v1 = vsub.f32 %v993_v63, %v991_v62 }
 0x276   : > { %v997_v3 = vmul.f32 %v996_v2, %v994_v0 }
 0x277   : > { %v998_v4 = vmul.f32 %v996_v2, %v995_v1 }
 0x278   : > { %v999_v5 = vadd.f32 %v997_v3, %v990_v60 }
 0x279   : > { %v1000_v6 = vadd.f32 %v998_v4, %v991_v62 }
 0x27a   : > { %1001 = vst [vmem:[#allocation8] sm:$0xff] %v999_v5 }
 0x27b   : > { %1002 = vst [vmem:[#allocation8 + $0x8] sm:$0xff] %v1000_v6 }
 0x27c PF: > { %p1688_p3 = scmp.eq.s32.totalorder %s1129_s0, 2  ;;  %s1419_s11 = smov [#allocation8]  }
 0x27d   : > { %s1013_s14 = sshll.u32 %s1419_s11, 4  ;;  %s1014_s14 = int_to_ptr.vmem [resolvable:$true] %s1013_s14 }
 0x27e   : > { %s1343_s17 = scalar_lea.vmem %s1014_s14, 256  ;;  %p1350_p9 = scmp.lt.s32.totalorder %s1014_s14, %s1014_s14 }
 0x27f   : > { %p1344_p4 = scmp.ne.s32.totalorder %s1014_s14, %s1343_s17  ;;  %p1351_p10 = scmp.lt.s32.totalorder %s1343_s17, %s1343_s17 }
 0x281   : > { %p1345_p5 = pnand %p1344_p4, %p1688_p3  ;;  %p1352_p13 = por %p1351_p10, %p1350_p9 }
 0x283   : > { %p1346_p6 = pneg %p1345_p5 }
 0x285   : > { %p1353_p1 = pnand %p1352_p13, %p1346_p6 }
 0x287   : > { %1356 = shalt.err (!%p1353_p1)
}
 0x288   : > { %s1357_s0 = scalar_lea.hbm %s1736_s7, 256 }
 0x289   : > { %p1358_p7 = scmp.ne.s32.totalorder %s1736_s7, %s1357_s0  ;;  %p1363_p12 = scmp.lt.u32.totalorder %s1357_s0, %s1736_s7 }
 0x28b   : > { %p1359_p8 = pnand %p1358_p7, %p1688_p3 }
 0x28d   : > { %p1360_p11 = pneg %p1359_p8 }
 0x28f   : > { %p1365_p0 = pnand %p1363_p12, %p1360_p11 }
 0x291   : > { %1368 = shalt.err (!%p1365_p0)
}
 0x292   : > { %1217 = dma.vmem_to_hbm [thread:$0]  (%p1688_p3), %s1014_s14, 256, %s1736_s7, [#allocation6]  }
 0x293   : > { %1394 = dma.done.wait (%p1688_p3), [#allocation6], 256  }
 0x294   : > { %1396 = vsyncadd (%p1688_p3), [#allocation6], 4294967040 }
 0x295 PF: > { %s20_s30 = sadd.s32 1, %s1415_s30   ;;  %s1748_s26 = smov %s1403_s27 }
 0x296   : > { %p17_p2 = scmp.ge.s32.totalorder %s20_s30, 5   ;;  %s1749_s27 = smov %s1522_s16 }
 0x297   : > { %s1750_s28 = smov %s1411_s29  ;;  %s1751_s29 = smov %s1753_s8 }
 0x298   :  { %19 = sbr.rel (!%p17_p2) target bundleno = 6 (0x6), region = 151 }
 0x29f   :  { %1026 = vsyncpa [#allocation5], 1 }
 0x2a0   :  { %1028 = vsyncpa [#allocation5 + $0x1], 1 }
 0x2a1   :  { %1029 = vsyncpa [#allocation6], 1 }
 0x2a2   :  { %1031 = vsyncpa [#allocation6 + $0x1], 1 }

</bundles_post_ra>
